<compile_context>
chip_gen: v5e
topology: v5e:2x2
jax: 0.10.0
libtpu: 0.0.40
codegen_flags: <defaults>
</compile_context>

<pallas_src>
import functools

import jax
import jax.numpy as jnp
from jax.experimental import pallas as pl
from jax.experimental.pallas import tpu as pltpu

VEC_SIGN = -1.0   # optmodel.modelSense == EPO.MINIMIZE
EPS = 1e-8        # F.cosine_similarity default eps


def _cave_kernel(pred_ref, ctrs_ref, out_ref, *, reduction, num_ctrs, dim,
                 batch, tile_b):
    i = pl.program_id(0)

    p = pred_ref[...].astype(jnp.float32)            # (TB, D)
    ctrs = ctrs_ref[...].astype(jnp.float32)         # (TB, K*D)  lane-dense

    # proj = sum_k tight_ctrs[:, k, :]  (== centroid up to a positive scale)
    proj = ctrs[:, 0:dim]
    for k in range(1, num_ctrs):
        proj = proj + ctrs[:, k * dim:(k + 1) * dim]

    dot = jnp.sum(p * proj, axis=1, keepdims=True)   # (TB, 1)
    p2 = jnp.sum(p * p, axis=1, keepdims=True)
    q2 = jnp.sum(proj * proj, axis=1, keepdims=True)
    # cos = dot / max(|p|*|proj|, eps)  via rsqrt on the (otherwise idle) EUP.
    inv = jax.lax.rsqrt(jnp.maximum(p2 * q2, EPS * EPS))
    loss = (-VEC_SIGN) * dot * inv                   # (TB, 1)

    if reduction == "none":
        # lane-dense output tile (1, TB); padded rows sliced off in the wrapper.
        out_ref[...] = loss.reshape(1, tile_b).astype(out_ref.dtype)
    else:
        @pl.when(i == 0)
        def _init():
            out_ref[...] = jnp.zeros_like(out_ref)

        # mask rows beyond the true batch in the last (partial) tile
        row = i * tile_b + jax.lax.broadcasted_iota(jnp.int32, (tile_b, 1), 0)
        masked = jnp.where(row < batch, loss, 0.0)
        out_ref[...] += jnp.sum(masked, axis=0, keepdims=True)   # (1, 1)

        if reduction == "mean":
            @pl.when(i == pl.num_programs(0) - 1)
            def _finalize():
                out_ref[...] = out_ref[...] * (1.0 / batch)


def _choose_tile_b(batch, num_ctrs, dim, itemsize):
    # ~8 MiB of double-buffered input per grid step: keeps full 2-deep
    # pipelining well under the scoped VMEM limit on v5e/v6e/v7x while being
    # large enough to amortize the per-step grid overhead.
    budget = 8 * 1024 * 1024
    per_row = 2 * (num_ctrs + 1) * dim * itemsize
    tb = min(budget // max(per_row, 1), 4096)
    tb = max(128, (tb // 128) * 128)   # multiple of 128 -> lane-dense 'none' out
    if tb >= batch:
        return batch                   # single full tile
    return int(tb)


def cone_aligned_cosine_loss(pred_cost, tight_ctrs, reduction="mean",
                             tile_b=None):
    """Pallas TPU implementation of abstractConeAlignedCosine.forward."""
    assert reduction in ("mean", "sum", "none")
    B, D = pred_cost.shape
    Bc, K, Dc = tight_ctrs.shape
    assert B == Bc and D == Dc

    # (B, K, D) -> (B, K*D): contiguous (zero-cost) and lane-dense, removing
    # the (K, D) sublane/lane padding blow-up for small K, D.
    ctrs_flat = tight_ctrs.reshape(B, K * D)

    itemsize = max(jnp.dtype(pred_cost.dtype).itemsize,
                   jnp.dtype(ctrs_flat.dtype).itemsize)
    TB = tile_b if tile_b is not None else _choose_tile_b(B, K, D, itemsize)
    if TB > B:
        TB = B
    if TB < B:
        assert TB % 128 == 0, "partial tiling requires a lane-dense tile size"
    NT = pl.cdiv(B, TB)

    if reduction == "none":
        out_shape = jax.ShapeDtypeStruct((1, NT * TB), jnp.float32)
        out_spec = pl.BlockSpec((1, TB), lambda i: (0, i))
        semantics = ("parallel",)            # independent tiles (megacore-able)
    else:
        out_shape = jax.ShapeDtypeStruct((1, 1), jnp.float32)
        out_spec = pl.BlockSpec((1, 1), lambda i: (0, 0))
        semantics = ("arbitrary",)           # resident accumulator across grid

    bytes_in = (pred_cost.size * jnp.dtype(pred_cost.dtype).itemsize
                + ctrs_flat.size * jnp.dtype(ctrs_flat.dtype).itemsize)
    out_elems = NT * TB if reduction == "none" else 1
    cost = pl.CostEstimate(flops=int(3 * B * K * D),
                           transcendentals=int(B),
                           bytes_accessed=int(bytes_in + 4 * out_elems))

    fn = pl.pallas_call(
        functools.partial(_cave_kernel, reduction=reduction, num_ctrs=K,
                          dim=D, batch=B, tile_b=TB),
        out_shape=out_shape,
        grid_spec=pltpu.PrefetchScalarGridSpec(
            num_scalar_prefetch=0,
            grid=(NT,),
            in_specs=[
                pl.BlockSpec((TB, D), lambda i: (i, 0)),
                pl.BlockSpec((TB, K * D), lambda i: (i, 0)),
            ],
            out_specs=out_spec,
        ),
        compiler_params=pltpu.CompilerParams(dimension_semantics=semantics),
        cost_estimate=cost,
    )
    # no wrapper-side dtype cast: inputs are DMA'd as-is (bf16 stays bf16),
    # the kernel upcasts to f32 after the load.
    out = fn(pred_cost, ctrs_flat)
    if reduction == "none":
        return out[0, :B]
    return out[0, 0]


def _reference(pred_cost, tight_ctrs, reduction="mean"):
    p = VEC_SIGN * pred_cost.astype(jnp.float32)
    proj = jnp.mean(tight_ctrs.astype(jnp.float32), axis=1)
    dot = jnp.sum(p * proj, axis=1)
    denom = jnp.maximum(
        jnp.linalg.norm(p, axis=1) * jnp.linalg.norm(proj, axis=1), EPS)
    loss = -(dot / denom)
    if reduction == "mean":
        return jnp.mean(loss)
    if reduction == "sum":
        return jnp.sum(loss)
    return loss


if __name__ == "__main__":
    key = jax.random.PRNGKey(0)

    # small single-tile case
    k1, k2 = jax.random.split(key)
    B, K, D = 8, 4, 32
    pred = jax.random.normal(k1, (B, D), dtype=jnp.float32)
    ctrs = jax.random.normal(k2, (B, K, D), dtype=jnp.float32)
    for red in ("mean", "sum", "none"):
        got = jax.block_until_ready(cone_aligned_cosine_loss(pred, ctrs, red))
        ref = _reference(pred, ctrs, red)
        assert jnp.allclose(got, ref, atol=1e-4, rtol=1e-4), (red, got, ref)

    # multi-tile case with a partial last tile: exercises the pipelined grid,
    # the mean/sum accumulator + row masking, and the lane-dense 'none' output.
    k3, k4 = jax.random.split(k2)
    B2, K2, D2 = 200, 4, 32
    pred2 = jax.random.normal(k3, (B2, D2), dtype=jnp.float32)
    ctrs2 = jax.random.normal(k4, (B2, K2, D2), dtype=jnp.float32)
    for red in ("mean", "sum", "none"):
        got = jax.block_until_ready(
            cone_aligned_cosine_loss(pred2, ctrs2, red, tile_b=128))
        ref = _reference(pred2, ctrs2, red)
        assert jnp.allclose(got, ref, atol=1e-4, rtol=1e-4), (red, got, ref)

    print("KERNEL_OK")
</pallas_src>

<mosaic_0001>
module attributes {stable_mosaic.version = 11 : i64} {
  func.func @_cave_kernel(%arg0: i32, %arg1: memref<8x32xf32, #tpu.memory_space<vmem>>, %arg2: memref<8x128xf32, #tpu.memory_space<vmem>>, %arg3: memref<1x1xf32, #tpu.memory_space<vmem>>) attributes {dimension_semantics = [#tpu.dimension_semantics<arbitrary>], iteration_bounds = array<i64: 1>, scalar_prefetch = 0 : i64, scratch_operands = 0 : i64, tpu.core_type = #tpu.core_type<tc>, window_params = [{transform_indices = @transform_0, window_bounds = array<i64: 8, 32>}, {transform_indices = @transform_1, window_bounds = array<i64: 8, 128>}, {pipeline_mode = #tpu.pipeline_mode<synchronous>, transform_indices = @transform_2, window_bounds = array<i64: 1, 1>}]} {
    %c0 = arith.constant 0 : index
    %c0_0 = arith.constant 0 : index
    %0 = vector.load %arg1[%c0, %c0_0] : memref<8x32xf32, #tpu.memory_space<vmem>>, vector<8x32xf32>
    %c0_1 = arith.constant 0 : index
    %c0_2 = arith.constant 0 : index
    %1 = vector.load %arg2[%c0_1, %c0_2] : memref<8x128xf32, #tpu.memory_space<vmem>>, vector<8x128xf32>
    %2 = vector.extract_strided_slice %1 {offsets = [0, 0], sizes = [8, 32], strides = [1, 1]} : vector<8x128xf32> to vector<8x32xf32>
    %3 = vector.extract_strided_slice %1 {offsets = [0, 32], sizes = [8, 32], strides = [1, 1]} : vector<8x128xf32> to vector<8x32xf32>
    %4 = arith.addf %2, %3 : vector<8x32xf32>
    %5 = vector.extract_strided_slice %1 {offsets = [0, 64], sizes = [8, 32], strides = [1, 1]} : vector<8x128xf32> to vector<8x32xf32>
    %6 = arith.addf %4, %5 : vector<8x32xf32>
    %7 = vector.extract_strided_slice %1 {offsets = [0, 96], sizes = [8, 32], strides = [1, 1]} : vector<8x128xf32> to vector<8x32xf32>
    %8 = arith.addf %6, %7 : vector<8x32xf32>
    %9 = arith.mulf %0, %8 : vector<8x32xf32>
    %cst = arith.constant dense<0.000000e+00> : vector<8xf32>
    %10 = vector.multi_reduction <add>, %9, %cst [1] : vector<8x32xf32> to vector<8xf32>
    %11 = vector.shape_cast %10 : vector<8xf32> to vector<8x1xf32>
    %12 = arith.mulf %0, %0 : vector<8x32xf32>
    %cst_3 = arith.constant dense<0.000000e+00> : vector<8xf32>
    %13 = vector.multi_reduction <add>, %12, %cst_3 [1] : vector<8x32xf32> to vector<8xf32>
    %14 = vector.shape_cast %13 : vector<8xf32> to vector<8x1xf32>
    %15 = arith.mulf %8, %8 : vector<8x32xf32>
    %cst_4 = arith.constant dense<0.000000e+00> : vector<8xf32>
    %16 = vector.multi_reduction <add>, %15, %cst_4 [1] : vector<8x32xf32> to vector<8xf32>
    %17 = vector.shape_cast %16 : vector<8xf32> to vector<8x1xf32>
    %18 = arith.mulf %14, %17 : vector<8x1xf32>
    %cst_5 = arith.constant 1.000000e-16 : f32
    %19 = vector.broadcast %cst_5 : f32 to vector<8x1xf32>
    %20 = arith.maximumf %18, %19 : vector<8x1xf32>
    %21 = math.rsqrt %20 : vector<8x1xf32>
    %cst_6 = arith.constant 1.000000e+00 : f32
    %22 = vector.broadcast %cst_6 : f32 to vector<8x1xf32>
    %23 = arith.mulf %22, %11 : vector<8x1xf32>
    %24 = arith.mulf %23, %21 : vector<8x1xf32>
    %c0_i32 = arith.constant 0 : i32
    %25 = arith.cmpi eq, %arg0, %c0_i32 : i32
    %26 = arith.extui %25 : i1 to i32
    %c0_i32_7 = arith.constant 0 : i32
    %27 = arith.cmpi ne, %26, %c0_i32_7 : i32
    scf.if %27 {
      %cst_17 = arith.constant 0.000000e+00 : f32
      %44 = vector.broadcast %cst_17 : f32 to vector<1x1xf32>
      %c0_18 = arith.constant 0 : index
      %c0_19 = arith.constant 0 : index
      %45 = vector.load %arg3[%c0_18, %c0_19] : memref<1x1xf32, #tpu.memory_space<vmem>>, vector<1x1xf32>
      tpu.vector_store %arg3[%c0_18, %c0_19], %44 {strides = array<i32>} : memref<1x1xf32, #tpu.memory_space<vmem>>, vector<1x1xf32>,
    } else {
    }
    %c8_i32 = arith.constant 8 : i32
    %28 = arith.muli %arg0, %c8_i32 : i32
    %29 = tpu.iota {dimensions = array<i32: 0>} : vector<8x1xi32>
    %30 = vector.broadcast %28 : i32 to vector<8x1xi32>
    %31 = arith.addi %30, %29 : vector<8x1xi32>
    %c8_i32_8 = arith.constant 8 : i32
    %32 = vector.broadcast %c8_i32_8 : i32 to vector<8x1xi32>
    %33 = arith.cmpi slt, %31, %32 : vector<8x1xi32>
    %cst_9 = arith.constant 0.000000e+00 : f32
    %34 = vector.broadcast %cst_9 : f32 to vector<8x1xf32>
    %35 = arith.select %33, %24, %34 : vector<8x1xi1>, vector<8x1xf32>
    %c0_10 = arith.constant 0 : index
    %c0_11 = arith.constant 0 : index
    %36 = vector.load %arg3[%c0_10, %c0_11] : memref<1x1xf32, #tpu.memory_space<vmem>>, vector<1x1xf32>
    %cst_12 = arith.constant dense<0.000000e+00> : vector<1xf32>
    %37 = vector.multi_reduction <add>, %35, %cst_12 [0] : vector<8x1xf32> to vector<1xf32>
    %38 = vector.shape_cast %37 : vector<1xf32> to vector<1x1xf32>
    %39 = arith.addf %36, %38 : vector<1x1xf32>
    %c0_13 = arith.constant 0 : index
    %c0_14 = arith.constant 0 : index
    %40 = vector.load %arg3[%c0_13, %c0_14] : memref<1x1xf32, #tpu.memory_space<vmem>>, vector<1x1xf32>
    tpu.vector_store %arg3[%c0_13, %c0_14], %39 {strides = array<i32>} : memref<1x1xf32, #tpu.memory_space<vmem>>, vector<1x1xf32>,
    %c0_i32_15 = arith.constant 0 : i32
    %41 = arith.cmpi eq, %arg0, %c0_i32_15 : i32
    %42 = arith.extui %41 : i1 to i32
    %c0_i32_16 = arith.constant 0 : i32
    %43 = arith.cmpi ne, %42, %c0_i32_16 : i32
    scf.if %43 {
      %c0_17 = arith.constant 0 : index
      %c0_18 = arith.constant 0 : index
      %44 = vector.load %arg3[%c0_17, %c0_18] : memref<1x1xf32, #tpu.memory_space<vmem>>, vector<1x1xf32>
      %cst_19 = arith.constant 1.250000e-01 : f32
      %45 = vector.broadcast %cst_19 : f32 to vector<1x1xf32>
      %46 = arith.mulf %44, %45 : vector<1x1xf32>
      %c0_20 = arith.constant 0 : index
      %c0_21 = arith.constant 0 : index
      %47 = vector.load %arg3[%c0_20, %c0_21] : memref<1x1xf32, #tpu.memory_space<vmem>>, vector<1x1xf32>
      tpu.vector_store %arg3[%c0_20, %c0_21], %46 {strides = array<i32>} : memref<1x1xf32, #tpu.memory_space<vmem>>, vector<1x1xf32>,
    } else {
    }
    return
  }
  func.func @transform_0(%arg0: i32) -> (i32, i32) {
    %c0_i32 = arith.constant 0 : i32
    %c0_i32_0 = arith.constant 0 : i32
    return %arg0, %c0_i32 : i32, i32
  }
  func.func @transform_1(%arg0: i32) -> (i32, i32) {
    %c0_i32 = arith.constant 0 : i32
    %c0_i32_0 = arith.constant 0 : i32
    return %arg0, %c0_i32 : i32, i32
  }
  func.func @transform_2(%arg0: i32) -> (i32, i32) {
    %c0_i32 = arith.constant 0 : i32
    %c0_i32_0 = arith.constant 0 : i32
    %c0_i32_1 = arith.constant 0 : i32
    return %c0_i32, %c0_i32_0 : i32, i32
  }
}

</mosaic_0001>

<bundles_post_ra>
// kernel: tpu_custom_call.1
= control target key start
LH: loop header
LB: loop body
LE: loop exit
PB: predicated region body
PF: predicated region fallthrough
CT: control target
= control target key end

     0   :  { %7 = vsyncpa [#allocation3], 0  ;;  %s249_s0 = inlined_call_operand.hbm [shape: f32[8,32], index: 0, kind: input, shape index: {}]   ;;  %s250_s1 = inlined_call_operand.hbm [shape: f32[8,128], index: 1, kind: input, shape index: {}]   ;;  %s251_s2 = inlined_call_operand.hbm [shape: f32[1,1], index: 2, kind: output, shape index: {}]  }
   0x1   :  { %8 = vsyncpa [#allocation6], 0 }
   0x2   :  { %9 = vsyncpa [#allocation4], 0  ;;  %s15_s11 = sshll.u32 %s249_s0, 4  ;;  %s215_s12 = smov [#allocation2]   ;;  %s16_s11 = int_to_ptr.hbm [resolvable:$true] %s15_s11 }
   0x3   :  { %s17_s13 = sshll.u32 %s215_s12, 4  ;;  %s26_s16 = sshll.u32 %s250_s1, 4  ;;  %s18_s13 = int_to_ptr.vmem [resolvable:$true] %s17_s13  ;;  %s27_s16 = int_to_ptr.hbm [resolvable:$true] %s26_s16 }
   0x4   :  { %20 = dma.hbm_to_vmem [thread:$0]  %s16_s11, 128, %s18_s13, [#allocation3]  }
   0x5   :  { %s216_s17 = smov [#allocation5]  }
   0x6   :  { %s28_s18 = sshll.u32 %s216_s17, 4  ;;  %s29_s18 = int_to_ptr.vmem [resolvable:$true] %s28_s18 }
   0x7   :  { %31 = dma.hbm_to_vmem [thread:$0]  %s27_s16, 128, %s29_s18, [#allocation6]  }
   0x8   :  { %209 = dma.done.wait [#allocation3], 128  }
   0x9   :  { %210 = vsyncadd [#allocation3], 4294967168 }
   0xa   :  { %211 = dma.done.wait [#allocation6], 128  }
   0xb   :  { %212 = vsyncadd [#allocation6], 4294967168  ;;  %v41_v0 = vld [vmem:[#allocation5] sm:$0xff]  ;;  %s217_s0 = smov 96   ;;  %s218_s19 = smov 32   ;;  %vm56_vm0 = vcmask 261120  }
   0xc   :  { %43 = vrot.lane.b32.xlu0 %v41_v0, %s217_s0  ;;  %51 = vrot.lane.b32.xlu1 %v41_v0, %s218_s19  ;;  %s219_s20 = smov 64   ;;  %v40_v1 = vld [vmem:[#allocation2] sm:$0xff]  ;;  %vm85_vm1 = vcmask 0   ;;  %v220_v14 = vmov 0.0   ;;  %s221_s1 = smov [#allocation7]  }
   0xd   :  { %v60_v2 = vmul.f32 %v40_v1, %v40_v1  ;;  %86 = vst.msk [vmem:[#allocation7] sm:$0x1] %vm85_vm1, %v220_v14  ;;  %s115_s21 = sshll.u32 %s221_s1, 4  ;;  %s117_s24 = sshll.u32 %s251_s2, 4  ;;  %s116_s21 = int_to_ptr.vmem [resolvable:$true] %s115_s21  ;;  %s118_s24 = int_to_ptr.hbm [resolvable:$true] %s117_s24 }
   0xf   :  { %v61_v3 = vsel %vm56_vm0, %v60_v2, 0.0 }
  0x14   :  { %47 = vrot.lane.b32.xlu0 %v41_v0, %s219_s20  ;;  %v94_v33 = vld [vmem:[#allocation7] sm:$0x1] }
  0x36   :  { %62 = vadd.xlane.f32.xlu1 %v61_v3 }
  0x7e   :  { %v44_v4 = vpop.permute.xlu0 %43  ;;  %v52_v7 = vpop.permute.xlu1 %51 }
  0x7f   :  { %v46_v5 = vadd.f32 %v44_v4, %v41_v0 }
  0x86   :  { %v48_v6 = vpop.permute.xlu0 %47 }
  0x87   :  { %v50_v8 = vadd.f32 %v48_v6, %v46_v5 }
  0x89   :  { %v54_v9 = vadd.f32 %v52_v7, %v50_v8 }
  0x8b   :  { %v64_v10 = vmul.f32 %v54_v9, %v54_v9  ;;  %v55_v12 = vmul.f32 %v54_v9, %v40_v1 }
  0x8d   :  { %v65_v11 = vsel %vm56_vm0, %v64_v10, 0.0  ;;  %v57_v13 = vsel %vm56_vm0, %v55_v12, 0.0 }
  0x8e   :  { %66 = vadd.xlane.f32.xlu2 %v65_v11 }
  0x96   :  { %58 = vadd.xlane.f32.xlu2 %v57_v13 }
  0xa9   :  { %v63_v15 = vpop.xlane.xlu1 %62 }
 0x101   :  { %v67_v16 = vpop.xlane.xlu2 %66 }
 0x102   :  { %v68_v17 = vmul.f32 %v67_v16, %v63_v15 }
 0x104   :  { %v69_v18 = vmax.f32 %v68_v17, 1e-16 }
 0x106   :  { %135 = vrsqrt.f32 %v69_v18  ;;  %vm76_vm3 = vweird.f32 %v69_v18 }
 0x109   :  { %v59_v26 = vpop.xlane.xlu2 %58 }
 0x10c   :  { %v136_v19 = vpop.eup %135 }
 0x10d   :  { %v71_v20 = vmul.f32 %v136_v19, %v69_v18  ;;  %vm77_vm2 = vweird.f32 %v136_v19 }
 0x10e   :  { %vm78_vm4 = vmor %vm76_vm3, %vm77_vm2 }
 0x10f   :  { %v72_v21 = vmul.f32 %v136_v19, %v71_v20 }
 0x111   :  { %v73_v22 = vmul.f32 0.5, %v72_v21 }
 0x113   :  { %v74_v23 = vsub.f32 1.5, %v73_v22 }
 0x115   :  { %v75_v24 = vmul.f32 %v136_v19, %v74_v23 }
 0x117   :  { %v79_v25 = vsel %vm78_vm4, %v136_v19, %v75_v24 }
 0x118   :  { %v80_v27 = vmul.f32 %v79_v25, %v59_v26 }
 0x11a   :  { %v95_v28 = vrot.slane %v80_v27, 4 }
 0x11c   :  { %v96_v29 = vadd.f32 %v95_v28, %v80_v27 }
 0x11e   :  { %v97_v30 = vrot.slane %v96_v29, 2 }
 0x120   :  { %v98_v31 = vadd.f32 %v97_v30, %v96_v29 }
 0x122   :  { %v99_v32 = vrot.slane %v98_v31, 1 }
 0x124   :  { %v100_v34 = vadd.f32 %v99_v32, %v98_v31 }
 0x126   :  { %v101_v35 = vadd.f32 %v100_v34, %v94_v33 }
 0x128   :  { %103 = vst.msk [vmem:[#allocation7] sm:$0x1] %vm85_vm1, %v101_v35 }
 0x12f   :  { %v107_v36 = vld [vmem:[#allocation7] sm:$0x1] }
 0x130   :  { %v108_v37 = vmul.f32 0.125, %v107_v36 }
 0x132   :  { %109 = vst.msk [vmem:[#allocation7] sm:$0x1] %vm85_vm1, %v108_v37 }
 0x133   :  { %120 = dma.vmem_to_hbm [thread:$0]  %s116_s21, 16, %s118_s24, [#allocation4]  }
 0x134   :  { %213 = dma.done.wait [#allocation4], 16  }
 0x135   :  { %214 = vsyncadd [#allocation4], 4294967280 }
 0x136   :  { %125 = vsyncpa [#allocation3], 1 }
 0x137   :  { %126 = vsyncpa [#allocation6], 1 }
 0x138   :  { %127 = vsyncpa [#allocation4], 1 }

</bundles_post_ra>
